<compile_context>
chip_gen: v7x
topology: tpu7x:2x2x1
jax: 0.10.0
libtpu: 0.0.40
codegen_flags: <defaults>
</compile_context>

<pallas_src>
import jax
import jax.numpy as jnp
from jax import lax
from jax.experimental import pallas as pl
from jax.experimental.pallas import tpu as pltpu


def _input_proj_kernel(x_ref, w_ref, b_ref, o_ref):
    # (T*B, D_in) @ (D_in, 4H) + (1, 4H) -> (T*B, 4H): one big MXU matmul,
    # hoisted out of the serial recurrence.
    o_ref[...] = (jnp.dot(x_ref[...], w_ref[...],
                          preferred_element_type=jnp.float32)
                  + b_ref[...])


def _lstm_recurrent_kernel(len_smem, len_ref, xg_ref, w_hh_ref,
                           w_out_ref, b_out_ref, y_ref):
    """Single grid step. Time loop runs inside the kernel; h/c/last are
    fori_loop carries (vregs), not scratch. Gate order is (i, f, o, g)."""
    T = xg_ref.shape[0]
    B = y_ref.shape[0]
    H = w_hh_ref.shape[0]

    # lengths are sorted descending -> lengths[0] is the max; skip dead steps.
    t_max = jnp.minimum(len_smem[0], T)

    lens = len_ref[...]                                  # (B, 1) int32
    h0 = jnp.zeros((B, H), jnp.float32)
    c0 = jnp.zeros((B, H), jnp.float32)
    last0 = jnp.zeros((B, H), jnp.float32)

    def step(t, carry):
        h, c, last = carry
        # Input projection (incl. combined bias) was precomputed -> only the
        # recurrent matmul remains in the serial loop.
        gates = xg_ref[t] + jnp.dot(h, w_hh_ref[...],
                                    preferred_element_type=jnp.float32)
        ifo = jax.nn.sigmoid(gates[:, :3 * H])           # one contiguous slice
        g = jnp.tanh(gates[:, 3 * H:])
        i = ifo[:, :H]
        f = ifo[:, H:2 * H]
        o = ifo[:, 2 * H:]
        c_new = f * c + i * g
        h_new = o * jnp.tanh(c_new)
        # Equivalent of output2[length[b]-1][b]: capture h at t == length[b]-1.
        last_new = jnp.where(lens == t + 1, h_new, last)
        return h_new, c_new, last_new

    _, _, last = lax.fori_loop(0, t_max, step, (h0, c0, last0))

    # Label projection; output block is lane-dense (padded to >=128 lanes).
    y_ref[...] = (jnp.dot(last, w_out_ref[...],
                          preferred_element_type=jnp.float32)
                  + b_out_ref[...]).astype(y_ref.dtype)


@jax.jit
def lstm_classifier_forward(x, lengths, w_ih, w_hh, b_ih, b_hh,
                            w_label, b_label):
    """x: (T, B, D_in) f32; lengths: (B,) int, sorted descending, 1 <= len <= T.
    w_ih: (4H, D_in), w_hh: (4H, H), b_*: (4H,)  -- PyTorch nn.LSTM convention.
    w_label: (L, H), b_label: (L,)               -- PyTorch nn.Linear convention.
    Returns y: (B, L)."""
    T, B, D_in = x.shape
    H = w_hh.shape[1]
    L = w_label.shape[0]
    L_pad = ((L + 127) // 128) * 128                 # lane-dense output width

    # Permute PyTorch gate order (i, f, g, o) -> (i, f, o, g).
    perm = jnp.concatenate([jnp.arange(0, 2 * H),
                            jnp.arange(3 * H, 4 * H),
                            jnp.arange(2 * H, 3 * H)])
    w_x = w_ih[perm].T                               # (D_in, 4H)
    w_h = w_hh[perm].T                               # (H, 4H)
    b = (b_ih + b_hh)[perm].reshape(1, 4 * H)        # combined bias

    # Pad the label projection to a lane-dense width; slice after the call.
    w_out = jnp.zeros((H, L_pad), jnp.float32).at[:, :L].set(w_label.T)
    b_out = jnp.zeros((1, L_pad), jnp.float32).at[:, :L].set(b_label)

    lens_i32 = lengths.astype(jnp.int32)             # (B,) -> SMEM via prefetch
    len2d = lens_i32.reshape(B, 1)                   # (B, 1) -> VMEM mask source

    # ---- Hoisted, time-parallel input projection (one MXU matmul). ----
    x2d = x.reshape(T * B, D_in)
    xg2d = pl.pallas_call(
        _input_proj_kernel,
        out_shape=jax.ShapeDtypeStruct((T * B, 4 * H), jnp.float32),
        grid=(1,),
        in_specs=[pl.BlockSpec((T * B, D_in), lambda i: (0, 0)),
                  pl.BlockSpec((D_in, 4 * H), lambda i: (0, 0)),
                  pl.BlockSpec((1, 4 * H), lambda i: (0, 0))],
        out_specs=pl.BlockSpec((T * B, 4 * H), lambda i: (0, 0)),
    )(x2d, w_x, b)
    xg = xg2d.reshape(T, B, 4 * H)

    # ---- Recurrent kernel: whole sequence resident, in-kernel time loop. ----
    # TODO(synk): for long sequences / large H, chunk time via grid=(T//Tc,)
    # (and cast matmul operands to bf16 on v6e/v7x) instead of full residency.
    grid_spec = pltpu.PrefetchScalarGridSpec(
        num_scalar_prefetch=1,                       # lengths -> SMEM
        grid=(1,),
        in_specs=[
            pl.BlockSpec((B, 1), lambda i, lens: (0, 0)),           # len2d
            pl.BlockSpec((T, B, 4 * H), lambda i, lens: (0, 0, 0)),  # xg
            pl.BlockSpec((H, 4 * H), lambda i, lens: (0, 0)),        # w_hh^T
            pl.BlockSpec((H, L_pad), lambda i, lens: (0, 0)),        # w_label^T
            pl.BlockSpec((1, L_pad), lambda i, lens: (0, 0)),        # b_label
        ],
        out_specs=pl.BlockSpec((B, L_pad), lambda i, lens: (0, 0)),
    )
    y_pad = pl.pallas_call(
        _lstm_recurrent_kernel,
        out_shape=jax.ShapeDtypeStruct((B, L_pad), jnp.float32),
        grid_spec=grid_spec,
        compiler_params=pltpu.CompilerParams(
            dimension_semantics=("arbitrary",)),
    )(lens_i32, len2d, xg, w_h, w_out, b_out)

    return y_pad[:, :L]


def _reference_forward(x, lengths, w_ih, w_hh, b_ih, b_hh, w_label, b_label):
    """Pure-JAX reference matching PyTorch nn.LSTM + gather-at-length + Linear."""
    T, B, D_in = x.shape
    H = w_hh.shape[1]
    h0 = jnp.zeros((B, H), jnp.float32)
    c0 = jnp.zeros((B, H), jnp.float32)

    def step(carry, x_t):
        h, c = carry
        gates = x_t @ w_ih.T + b_ih + h @ w_hh.T + b_hh
        i = jax.nn.sigmoid(gates[:, 0 * H:1 * H])
        f = jax.nn.sigmoid(gates[:, 1 * H:2 * H])
        g = jnp.tanh(gates[:, 2 * H:3 * H])
        o = jax.nn.sigmoid(gates[:, 3 * H:4 * H])
        c_new = f * c + i * g
        h_new = o * jnp.tanh(c_new)
        return (h_new, c_new), h_new

    _, hs = lax.scan(step, (h0, c0), x)               # (T, B, H)
    last = hs[lengths - 1, jnp.arange(B)]             # (B, H)
    return last @ w_label.T + b_label


if __name__ == "__main__":
    # Small shapes consistent with the module's forward.
    T, B, D_IN, H, L = 8, 2, 16, 32, 4

    key = jax.random.PRNGKey(0)
    k = jax.random.split(key, 8)
    x = jax.random.normal(k[0], (T, B, D_IN), jnp.float32)
    lengths = jnp.array([8, 5], dtype=jnp.int32)       # sorted descending, <= T

    scale = 0.1
    w_ih = scale * jax.random.normal(k[1], (4 * H, D_IN), jnp.float32)
    w_hh = scale * jax.random.normal(k[2], (4 * H, H), jnp.float32)
    b_ih = scale * jax.random.normal(k[3], (4 * H,), jnp.float32)
    b_hh = scale * jax.random.normal(k[4], (4 * H,), jnp.float32)
    w_label = scale * jax.random.normal(k[5], (L, H), jnp.float32)
    b_label = scale * jax.random.normal(k[6], (L,), jnp.float32)

    y = lstm_classifier_forward(x, lengths, w_ih, w_hh, b_ih, b_hh,
                                w_label, b_label)
    y = jax.block_until_ready(y)

    y_ref = _reference_forward(x, lengths, w_ih, w_hh, b_ih, b_hh,
                               w_label, b_label)
    assert y.shape == (B, L)
    assert jnp.allclose(y, y_ref, rtol=1e-4, atol=1e-4), (y, y_ref)

    print("KERNEL_OK")
</pallas_src>

<mosaic_0001>
module attributes {stable_mosaic.version = 11 : i64} {
  func.func @_input_proj_kernel(%arg0: i32, %arg1: memref<16x16xf32, #tpu.memory_space<vmem>>, %arg2: memref<16x128xf32, #tpu.memory_space<vmem>>, %arg3: memref<1x128xf32, #tpu.memory_space<vmem>>, %arg4: memref<16x128xf32, #tpu.memory_space<vmem>>) attributes {dimension_semantics = [#tpu.dimension_semantics<arbitrary>], iteration_bounds = array<i64: 1>, scalar_prefetch = 0 : i64, scratch_operands = 0 : i64, tpu.core_type = #tpu.core_type<tc>, window_params = [{pipeline_mode = #tpu.pipeline_mode<synchronous>, transform_indices = @transform_0, window_bounds = array<i64: 16, 16>}, {pipeline_mode = #tpu.pipeline_mode<synchronous>, transform_indices = @transform_1, window_bounds = array<i64: 16, 128>}, {pipeline_mode = #tpu.pipeline_mode<synchronous>, transform_indices = @transform_2, window_bounds = array<i64: 1, 128>}, {pipeline_mode = #tpu.pipeline_mode<synchronous>, transform_indices = @transform_3, window_bounds = array<i64: 16, 128>}]} {
    %c0 = arith.constant 0 : index
    %c0_0 = arith.constant 0 : index
    %0 = vector.load %arg1[%c0, %c0_0] : memref<16x16xf32, #tpu.memory_space<vmem>>, vector<16x16xf32>
    %c0_1 = arith.constant 0 : index
    %c0_2 = arith.constant 0 : index
    %1 = vector.load %arg2[%c0_1, %c0_2] : memref<16x128xf32, #tpu.memory_space<vmem>>, vector<16x128xf32>
    %cst = arith.constant dense<0.000000e+00> : vector<16x128xf32>
    %2 = tpu.matmul %0, %1, %cst {dimension_numbers = #tpu.dot_dimension_numbers<[1], [0], [0], [1], [0, 0, 1, 1], [], []>} : vector<16x16xf32>, vector<16x128xf32>, vector<16x128xf32> -> vector<16x128xf32>
    %c0_3 = arith.constant 0 : index
    %c0_4 = arith.constant 0 : index
    %3 = vector.load %arg3[%c0_3, %c0_4] : memref<1x128xf32, #tpu.memory_space<vmem>>, vector<1x128xf32>
    %4 = vector.broadcast %3 : vector<1x128xf32> to vector<16x128xf32>
    %5 = arith.addf %2, %4 : vector<16x128xf32>
    %c0_5 = arith.constant 0 : index
    %c0_6 = arith.constant 0 : index
    %6 = vector.load %arg4[%c0_5, %c0_6] : memref<16x128xf32, #tpu.memory_space<vmem>>, vector<16x128xf32>
    tpu.vector_store %arg4[%c0_5, %c0_6], %5 {strides = array<i32>} : memref<16x128xf32, #tpu.memory_space<vmem>>, vector<16x128xf32>,
    return
  }
  func.func @transform_0(%arg0: i32) -> (i32, i32) {
    %c0_i32 = arith.constant 0 : i32
    %c0_i32_0 = arith.constant 0 : i32
    %c0_i32_1 = arith.constant 0 : i32
    return %c0_i32, %c0_i32_0 : i32, i32
  }
  func.func @transform_1(%arg0: i32) -> (i32, i32) {
    %c0_i32 = arith.constant 0 : i32
    %c0_i32_0 = arith.constant 0 : i32
    %c0_i32_1 = arith.constant 0 : i32
    return %c0_i32, %c0_i32_0 : i32, i32
  }
  func.func @transform_2(%arg0: i32) -> (i32, i32) {
    %c0_i32 = arith.constant 0 : i32
    %c0_i32_0 = arith.constant 0 : i32
    %c0_i32_1 = arith.constant 0 : i32
    return %c0_i32, %c0_i32_0 : i32, i32
  }
  func.func @transform_3(%arg0: i32) -> (i32, i32) {
    %c0_i32 = arith.constant 0 : i32
    %c0_i32_0 = arith.constant 0 : i32
    %c0_i32_1 = arith.constant 0 : i32
    return %c0_i32, %c0_i32_0 : i32, i32
  }
}

module attributes {stable_mosaic.version = 11 : i64} {
  func.func @_lstm_recurrent_kernel(%arg0: i32, %arg1: memref<2xi32, #tpu.memory_space<smem>>, %arg2: memref<2x1xi32, #tpu.memory_space<vmem>>, %arg3: memref<8x2x128xf32, #tpu.memory_space<vmem>>, %arg4: memref<32x128xf32, #tpu.memory_space<vmem>>, %arg5: memref<32x128xf32, #tpu.memory_space<vmem>>, %arg6: memref<1x128xf32, #tpu.memory_space<vmem>>, %arg7: memref<2x128xf32, #tpu.memory_space<vmem>>) attributes {dimension_semantics = [#tpu.dimension_semantics<arbitrary>], iteration_bounds = array<i64: 1>, scalar_prefetch = 1 : i64, scratch_operands = 0 : i64, tpu.core_type = #tpu.core_type<tc>, window_params = [{pipeline_mode = #tpu.pipeline_mode<synchronous>, transform_indices = @transform_0, window_bounds = array<i64: 2, 1>}, {pipeline_mode = #tpu.pipeline_mode<synchronous>, transform_indices = @transform_1, window_bounds = array<i64: 8, 2, 128>}, {pipeline_mode = #tpu.pipeline_mode<synchronous>, transform_indices = @transform_2, window_bounds = array<i64: 32, 128>}, {pipeline_mode = #tpu.pipeline_mode<synchronous>, transform_indices = @transform_3, window_bounds = array<i64: 32, 128>}, {pipeline_mode = #tpu.pipeline_mode<synchronous>, transform_indices = @transform_4, window_bounds = array<i64: 1, 128>}, {pipeline_mode = #tpu.pipeline_mode<synchronous>, transform_indices = @transform_5, window_bounds = array<i64: 2, 128>}]} {
    %c0 = arith.constant 0 : index
    %0 = memref.load %arg1[%c0] : memref<2xi32, #tpu.memory_space<smem>>
    %c8_i32 = arith.constant 8 : i32
    %1 = arith.minsi %0, %c8_i32 : i32
    %c0_0 = arith.constant 0 : index
    %c0_1 = arith.constant 0 : index
    %2 = vector.load %arg2[%c0_0, %c0_1] : memref<2x1xi32, #tpu.memory_space<vmem>>, vector<2x1xi32>
    %cst = arith.constant 0.000000e+00 : f32
    %3 = vector.broadcast %cst : f32 to vector<2x32xf32>
    %cst_2 = arith.constant 0.000000e+00 : f32
    %4 = vector.broadcast %cst_2 : f32 to vector<2x32xf32>
    %cst_3 = arith.constant 0.000000e+00 : f32
    %5 = vector.broadcast %cst_3 : f32 to vector<2x32xf32>
    %c0_i32 = arith.constant 0 : i32
    %6 = arith.subi %1, %c0_i32 : i32
    %7 = arith.addi %c0_i32, %6 : i32
    %c1_i32 = arith.constant 1 : i32
    %8:3 = scf.for %arg8 = %c0_i32 to %7 step %c1_i32 iter_args(%arg9 = %3, %arg10 = %4, %arg11 = %5) -> (vector<2x32xf32>, vector<2x32xf32>, vector<2x32xf32>)  : i32 {
      %15 = arith.index_cast %arg8 : i32 to index
      %c0_11 = arith.constant 0 : index
      %c0_12 = arith.constant 0 : index
      %16 = vector.load %arg3[%15, %c0_11, %c0_12] : memref<8x2x128xf32, #tpu.memory_space<vmem>>, vector<1x2x128xf32>
      %17 = vector.shape_cast %16 : vector<1x2x128xf32> to vector<2x128xf32>
      %c0_13 = arith.constant 0 : index
      %c0_14 = arith.constant 0 : index
      %18 = vector.load %arg4[%c0_13, %c0_14] : memref<32x128xf32, #tpu.memory_space<vmem>>, vector<32x128xf32>
      %cst_15 = arith.constant dense<0.000000e+00> : vector<2x128xf32>
      %19 = tpu.matmul %arg9, %18, %cst_15 {dimension_numbers = #tpu.dot_dimension_numbers<[1], [0], [0], [1], [0, 0, 1, 1], [], []>} : vector<2x32xf32>, vector<32x128xf32>, vector<2x128xf32> -> vector<2x128xf32>
      %20 = arith.addf %17, %19 : vector<2x128xf32>
      %21 = vector.extract_strided_slice %20 {offsets = [0, 0], sizes = [2, 96], strides = [1, 1]} : vector<2x128xf32> to vector<2x96xf32>
      %22 = arith.negf %21 : vector<2x96xf32>
      %23 = math.exp %22 : vector<2x96xf32>
      %cst_16 = arith.constant 1.000000e+00 : f32
      %24 = vector.broadcast %cst_16 : f32 to vector<2x96xf32>
      %25 = arith.addf %24, %23 : vector<2x96xf32>
      %26 = arith.divf %24, %25 : vector<2x96xf32>
      %27 = vector.extract_strided_slice %20 {offsets = [0, 96], sizes = [2, 32], strides = [1, 1]} : vector<2x128xf32> to vector<2x32xf32>
      %28 = math.tanh %27 : vector<2x32xf32>
      %29 = vector.extract_strided_slice %26 {offsets = [0, 0], sizes = [2, 32], strides = [1, 1]} : vector<2x96xf32> to vector<2x32xf32>
      %30 = vector.extract_strided_slice %26 {offsets = [0, 32], sizes = [2, 32], strides = [1, 1]} : vector<2x96xf32> to vector<2x32xf32>
      %31 = vector.extract_strided_slice %26 {offsets = [0, 64], sizes = [2, 32], strides = [1, 1]} : vector<2x96xf32> to vector<2x32xf32>
      %32 = arith.mulf %30, %arg10 : vector<2x32xf32>
      %33 = arith.mulf %29, %28 : vector<2x32xf32>
      %34 = arith.addf %32, %33 : vector<2x32xf32>
      %35 = math.tanh %34 : vector<2x32xf32>
      %36 = arith.mulf %31, %35 : vector<2x32xf32>
      %c1_i32_17 = arith.constant 1 : i32
      %37 = arith.addi %arg8, %c1_i32_17 : i32
      %38 = vector.broadcast %37 : i32 to vector<2x1xi32>
      %39 = arith.cmpi eq, %2, %38 : vector<2x1xi32>
      %40 = vector.shape_cast %39 : vector<2x1xi1> to vector<2x1xi1>
      %41 = vector.broadcast %40 : vector<2x1xi1> to vector<2x32xi1>
      %42 = arith.select %41, %36, %arg11 : vector<2x32xi1>, vector<2x32xf32>
      scf.yield %36, %34, %42 : vector<2x32xf32>, vector<2x32xf32>, vector<2x32xf32>
    }
    %c0_4 = arith.constant 0 : index
    %c0_5 = arith.constant 0 : index
    %9 = vector.load %arg5[%c0_4, %c0_5] : memref<32x128xf32, #tpu.memory_space<vmem>>, vector<32x128xf32>
    %cst_6 = arith.constant dense<0.000000e+00> : vector<2x128xf32>
    %10 = tpu.matmul %8#2, %9, %cst_6 {dimension_numbers = #tpu.dot_dimension_numbers<[1], [0], [0], [1], [0, 0, 1, 1], [], []>} : vector<2x32xf32>, vector<32x128xf32>, vector<2x128xf32> -> vector<2x128xf32>
    %c0_7 = arith.constant 0 : index
    %c0_8 = arith.constant 0 : index
    %11 = vector.load %arg6[%c0_7, %c0_8] : memref<1x128xf32, #tpu.memory_space<vmem>>, vector<1x128xf32>
    %12 = vector.broadcast %11 : vector<1x128xf32> to vector<2x128xf32>
    %13 = arith.addf %10, %12 : vector<2x128xf32>
    %c0_9 = arith.constant 0 : index
    %c0_10 = arith.constant 0 : index
    %14 = vector.load %arg7[%c0_9, %c0_10] : memref<2x128xf32, #tpu.memory_space<vmem>>, vector<2x128xf32>
    tpu.vector_store %arg7[%c0_9, %c0_10], %13 {strides = array<i32>} : memref<2x128xf32, #tpu.memory_space<vmem>>, vector<2x128xf32>,
    return
  }
  func.func @transform_0(%arg0: i32, %arg1: memref<2xi32, #tpu.memory_space<smem>>) -> (i32, i32) {
    %c0_i32 = arith.constant 0 : i32
    %c0_i32_0 = arith.constant 0 : i32
    %c0_i32_1 = arith.constant 0 : i32
    return %c0_i32, %c0_i32_0 : i32, i32
  }
  func.func @transform_1(%arg0: i32, %arg1: memref<2xi32, #tpu.memory_space<smem>>) -> (i32, i32, i32) {
    %c0_i32 = arith.constant 0 : i32
    %c0_i32_0 = arith.constant 0 : i32
    %c0_i32_1 = arith.constant 0 : i32
    %c0_i32_2 = arith.constant 0 : i32
    return %c0_i32, %c0_i32_0, %c0_i32_1 : i32, i32, i32
  }
  func.func @transform_2(%arg0: i32, %arg1: memref<2xi32, #tpu.memory_space<smem>>) -> (i32, i32) {
    %c0_i32 = arith.constant 0 : i32
    %c0_i32_0 = arith.constant 0 : i32
    %c0_i32_1 = arith.constant 0 : i32
    return %c0_i32, %c0_i32_0 : i32, i32
  }
  func.func @transform_3(%arg0: i32, %arg1: memref<2xi32, #tpu.memory_space<smem>>) -> (i32, i32) {
    %c0_i32 = arith.constant 0 : i32
    %c0_i32_0 = arith.constant 0 : i32
    %c0_i32_1 = arith.constant 0 : i32
    return %c0_i32, %c0_i32_0 : i32, i32
  }
  func.func @transform_4(%arg0: i32, %arg1: memref<2xi32, #tpu.memory_space<smem>>) -> (i32, i32) {
    %c0_i32 = arith.constant 0 : i32
    %c0_i32_0 = arith.constant 0 : i32
    %c0_i32_1 = arith.constant 0 : i32
    return %c0_i32, %c0_i32_0 : i32, i32
  }
  func.func @transform_5(%arg0: i32, %arg1: memref<2xi32, #tpu.memory_space<smem>>) -> (i32, i32) {
    %c0_i32 = arith.constant 0 : i32
    %c0_i32_0 = arith.constant 0 : i32
    %c0_i32_1 = arith.constant 0 : i32
    return %c0_i32, %c0_i32_0 : i32, i32
  }
}

</mosaic_0001>

<bundles_post_ra>
// kernel: lstm_classifier_forward.2
= control target key start
LH: loop header
LB: loop body
LE: loop exit
PB: predicated region body
PF: predicated region fallthrough
CT: control target
= control target key end

     0   :  { %vm25_vm0 = vcmask 130048   ;;  %s172_s1 = inlined_call_operand.vmem [shape: f32[16,128], index: 1, kind: input, shape index: {}]   ;;  %s173_s0 = inlined_call_operand.vmem [shape: f32[16,16], index: 0, kind: input, shape index: {}]   ;;  %s174_s2 = inlined_call_operand.vmem [shape: f32[1,128], index: 2, kind: input, shape index: {}]   ;;  %s175_s3 = inlined_call_operand.vmem [shape: f32[16,128], index: 3, kind: output, shape index: {}]  }
   0x1   :  { %v16_v0 = vld [vmem:[%s172_s1] sm:$0xff]  ;;  %v17_v1 = vld [vmem:[%s172_s1 + $0x8] sm:$0xff] }
   0x2   :  { %v14_v2 = vld [vmem:[%s173_s0] sm:$0xff]  ;;  %v127_v3 = vpack.c.bf16 %v17_v1, %v16_v0  ;;  %v15_v4 = vld [vmem:[%s173_s0 + $0x8] sm:$0xff] }
   0x3   :  { %124 = vmatprep.mubr.msk.f32.mxu0 %vm25_vm0, %v14_v2  ;;  %v113_v5 = vld [vmem:[%s174_s2] ss:$0 sm:$0xff] }
   0x4   :  { %128 = vmatprep.subr.bf16.mxu0 %v127_v3 }
   0x5   :  { %130 = vmatpush3.bf16.msra.mxu0 %v127_v3 }
   0x8   :  { %125 = vmatmul.mubr.msk.f32.vlgmr.msra.gmra.mrb[0].mxu0 %vm25_vm0, %v15_v4 }
  0xdb   :  { %v126_v6 = vpop.f32.mrb[0].mxu0 }
  0xdc   :  { %v104_v7 = vadd.f32 %v126_v6, %v113_v5  ;;  %v98_v8 = vpop.f32.mrb[1].mxu0 }
  0xdd   :  { %v99_v9 = vadd.f32 %v113_v5, %v98_v8 }
  0xde   :  { %108 = vst [vmem:[%s175_s3 + $0x8] sm:$0xff] %v104_v7 }
  0xdf   :  { %107 = vst [vmem:[%s175_s3] sm:$0xff] %v99_v9 }

// kernel: lstm_classifier_forward.3
= control target key start
LH: loop header
LB: loop body
LE: loop exit
PB: predicated region body
PF: predicated region fallthrough
CT: control target
= control target key end

     0   :  { %s599_s0 = inlined_call_operand.vmem [shape: s32[2], index: 0, kind: input, shape index: {}]   ;;  %s600_s1 = inlined_call_operand.vmem [shape: s32[2,1], index: 1, kind: input, shape index: {}]   ;;  %s601_s2 = inlined_call_operand.vmem [shape: f32[8,2,128], index: 2, kind: input, shape index: {}]   ;;  %s602_s3 = inlined_call_operand.vmem [shape: f32[32,128], index: 3, kind: input, shape index: {}]   ;;  %s603_s4 = inlined_call_operand.vmem [shape: f32[32,128], index: 4, kind: input, shape index: {}]   ;;  %s604_s5 = inlined_call_operand.vmem [shape: f32[1,128], index: 5, kind: input, shape index: {}]   ;;  %s605_s6 = inlined_call_operand.hbm [shape: f32[2,128], index: 6, kind: output, shape index: {}]  }
   0x1   :  { %s11_s23 = sshll.u32 %s599_s0, 4  ;;  %s12_s23 = int_to_ptr.vmem [resolvable:$true] %s11_s23 }
   0x2   :  { %s391_s24 = scalar_lea.vmem %s12_s23, 16  ;;  %p396_p1 = scmp.lt.s32.totalorder %s12_s23, %s12_s23 }
   0x3   :  { %p392_p0 = scmp.ne.s32.totalorder %s12_s23, %s391_s24  ;;  %p397_p2 = scmp.lt.s32.totalorder %s391_s24, %s391_s24 }
   0x5   :  { %p398_p3 = por %p397_p2, %p396_p1 }
   0x7   :  { %p399_p4 = pnand %p398_p3, %p392_p0 }
   0x9   :  { %402 = shalt.err (!%p399_p4)  }
   0xa   :  { %s469_s25 = smov [#allocation3]  }
   0xb   :  { %14 = dma.vmem_to_smem %s12_s23, 16, %s469_s25, [#allocation2] }
   0xc   :  { %445 = dma.done.wait [#allocation2], 16 }
   0xd   :  { %446 = vsyncadd [#allocation2], 4294967280 }
   0xe   :  { %16 = sfence }
   0xf   :  { %17 = vsyncpa [#allocation5], 0  ;;  %s28_s26 = sld [smem:[#allocation3]]  ;;  %v522_v0 = vld [vmem:[%s600_s1] sm:$0x3]  ;;  %v526_v1 = vmov 0.0  }
  0x15   :  { %p29_p5 = scmp.lt.s32.totalorder %s28_s26, 8  ;;  %p282_p6 = scmp.le.s32.totalorder %s28_s26, 0 }
  0x16   :  { %v528_v2 = vmov (!%p282_p6), 0.0   ;;  %v530_v3 = vmov (!%p282_p6), 0.0   ;;  %v532_v4 = vmov (!%p282_p6), 0.0   ;;  %s534_s29 = smov (!%p282_p6), 0  }
  0x17   :  { %s524_s0 = scalar_select %p29_p5, %s28_s26, 8 }
  0x18   :  { %267 = sbr.rel (%p282_p6) target bundleno = 736 (0x2e0), region = 42 }
  0x1f LB: > { %v44_v5 = vld [vmem:[%s602_s3] sm:$0xff]  ;;  %v45_v6 = vld [vmem:[%s602_s3 + $0x8] sm:$0xff]  ;;  %v46_v7 = vld [vmem:[%s602_s3 + $0x10] sm:$0xff]  ;;  %v470_v8 = vmov 0.0|0.0   ;;  %s471_s13 = smov 64   ;;  %vm472_vm0 = vmmov 0   ;;  %s463_s29 = sphi %s534_s29, %s149_s29   ;;  %v459_v4 = vphi %v532_v4, %v148_v4   ;;  %v455_v3 = vphi %v530_v3, %v142_v3   ;;  %v451_v2 = vphi %v528_v2, %v606_v2  }
  0x20   : > { %317 = vmatprep.subr.bf16.mxu0 %v470_v8  ;;  %v318_v9 = vpack.c.bf16 %v45_v6, %v44_v5  ;;  %v47_v10 = vld [vmem:[%s602_s3 + $0x18] sm:$0xff]  ;;  %49 = vrot.lane.b32.xlu0 %v459_v4, %s471_s13  ;;  %v473_v11 = vmov 0.0   ;;  %vm51_vm1 = vcmask 261120   ;;  %s277_s14 = sshll.u32 %s463_s29, 1  ;;  %s474_s18 = smov 32   ;;  %v475_v22 = vmov 0  }
  0x21   : > { %303 = vmatprep.mubr.msk.f32.mxu0 %vm472_vm0, %v473_v11  ;;  %v321_v12 = vpack.c.bf16 %v47_v10, %v46_v7  ;;  %s42_s17 = scalar_lea.vmem %s601_s2, %s277_s14  ;;  %381 = vset.pattern.permute.xlu1 %v475_v22  ;;  %s149_s29 = sadd.s32 1, %s463_s29  }
  0x22   : > { %319 = vmatpush3.bf16.msra.mxu0 %v318_v9  ;;  %v43_v14 = vld [vmem:[%s42_s17] sm:$0x3]  ;;  %382 = vset.pattern.permute.xlu0 %v475_v22  ;;  %v150_v23 = vstv %s149_s29  ;;  %p34_p7 = scmp.ge.s32.totalorder %s149_s29, %s524_s0 }
  0x23   : > { %320 = vmatprep.subr.bf16.mxu0 %v470_v8  ;;  %vm151_vm2 = vcmp.eq.s32.totalorder %v522_v0, %v150_v23 }
  0x24   : > { %v152_v27 = vsel %vm151_vm2, 1, %v475_v22 }
  0x26   : > { %322 = vmatpush3.bf16.msra.mxu0 %v321_v12 }
  0x92   : > { %v50_v13 = vpop.permute.xlu0 %49 }
  0x93   : > { %304 = vmatmul.mubr.msk.f32.vlgmr.msra.gmra.mrb[0].mxu0 %vm51_vm1, %v50_v13 }
 0x166   : > { %v120_v15 = vpop.f32.mrb[0].mxu0 }
 0x167   : > { %v124_v16 = vadd.f32 %v120_v15, %v43_v14  ;;  %v305_v17 = vpop.f32.mrb[1].mxu0 }
 0x169   : > { %383 = vtanh.f32 %v124_v16  ;;  %v279_v19 = vmul.f32 -1.442695, %v124_v16 }
 0x16b   : > { %385 = vpow2.f32 %v279_v19 }
 0x173   : > { %v384_v18 = vpop.eup %383 }
 0x174   : > { %134 = vrot.lane.b32.xlu0 %v384_v18, %s474_s18 }
 0x175   : > { %v386_v20 = vpop.eup %385 }
 0x176   : > { %v128_v21 = vadd.f32 1.0, %v386_v20 }
 0x178   : > { %387 = vrcp.f32 %v128_v21 }
 0x182   : > { %v388_v24 = vpop.eup %387 }
 0x183   : > { %v132_v28 = vmul.f32 %v455_v3, %v388_v24 }
 0x1e6   : > { %v135_v25 = vpop.permute.xlu0 %134 }
 0x1e7   : > { %v137_v26 = vmul.f32 %v388_v24, %v135_v25 }
 0x1e9   : > { %139 = vrot.lane.b32.xlu1 %v137_v26, %s474_s18 }
 0x1ed   : > { %154 = vperm.xlu1 %381, %v152_v27  }
 0x25b   : > { %v140_v29 = vpop.permute.xlu1 %139 }
 0x25c   : > { %v142_v3 = vadd.f32 %v140_v29, %v132_v28  }
 0x25e   : > { %389 = vtanh.f32 %v142_v3 }
 0x268   : > { %v390_v30 = vpop.eup %389 }
 0x269   : > { %145 = vrot.lane.b32.xlu0 %v390_v30, %s474_s18 }
 0x26c   : > { %v155_v31 = vpop.permute.xlu1 %154 }
 0x26d   : > { %vm156_vm3 = vcmp.eq.s32.totalorder %v155_v31, 1 }
 0x2d9   :  { %37 = sbr.rel (!%p34_p7) target bundleno = 31 (0x1f), region = 48 }
 0x2db   : > { %v146_v32 = vpop.permute.xlu0 %145 }
 0x2dc   : > { %v148_v4 = vmul.f32 %v388_v24, %v146_v32  }
 0x2de   : > { %v157_v33 = vsel %vm156_vm3, %v148_v4, %v451_v2  }
 0x2df   : > { %v606_v2 = vmov %v157_v33  ;;  %v607_v1 = vmov (%p34_p7), %v157_v33 }
 0x2e0 PF:  { %v158_v34 = vld [vmem:[%s603_s4] sm:$0xff]  ;;  %v159_v35 = vld [vmem:[%s603_s4 + $0x8] sm:$0xff]  ;;  %v160_v36 = vld [vmem:[%s603_s4 + $0x10] sm:$0xff]  ;;  %s476_s25 = smov 64   ;;  %v477_v37 = vmov 0.0|0.0   ;;  %vm478_vm4 = vmmov 0   ;;  %v467_v1 = vphi %v526_v1, %v607_v1  }
 0x2e1   :  { %170 = vrot.lane.b32.xlu0 %v467_v1, %s476_s25  ;;  %323 = vmatprep.subr.bf16.mxu0 %v477_v37  ;;  %v324_v38 = vpack.c.bf16 %v159_v35, %v158_v34  ;;  %v161_v39 = vld [vmem:[%s603_s4 + $0x18] sm:$0xff]  ;;  %v479_v40 = vmov 0.0   ;;  %vm172_vm5 = vcmask 261120   ;;  %v280_v43 = vld [vmem:[%s604_s5] ss:$0 sm:$0xff]  ;;  %s480_s28 = smov [#allocation4]  }
 0x2e2   :  { %314 = vmatprep.mubr.msk.f32.mxu0 %vm478_vm4, %v479_v40  ;;  %v327_v41 = vpack.c.bf16 %v161_v39, %v160_v36  ;;  %s252_s0 = sshll.u32 %s480_s28, 4  ;;  %s253_s0 = int_to_ptr.vmem [resolvable:$true] %s252_s0 }
 0x2e3   :  { %325 = vmatpush3.bf16.msra.mxu0 %v324_v38  ;;  %s403_s4 = scalar_lea.vmem %s253_s0, 32  ;;  %p408_p9 = scmp.lt.s32.totalorder %s253_s0, %s253_s0 }
 0x2e4   :  { %326 = vmatprep.subr.bf16.mxu0 %v477_v37  ;;  %p404_p8 = scmp.ne.s32.totalorder %s253_s0, %s403_s4  ;;  %p409_p10 = scmp.lt.s32.totalorder %s403_s4, %s403_s4 }
 0x2e6   :  { %p410_p11 = por %p409_p10, %p408_p9 }
 0x2e7   :  { %328 = vmatpush3.bf16.msra.mxu0 %v327_v41 }
 0x2e8   :  { %p411_p12 = pnand %p410_p11, %p404_p8 }
 0x353   :  { %v171_v42 = vpop.permute.xlu0 %170 }
 0x354   :  { %315 = vmatmul.mubr.msk.f32.vlgmr.msra.gmra.mrb[0].mxu0 %vm172_vm5, %v171_v42 }
 0x427   :  { %v241_v44 = vpop.f32.mrb[0].mxu0 }
 0x428   :  { %v242_v45 = vadd.f32 %v280_v43, %v241_v44  ;;  %v316_v46 = vpop.f32.mrb[1].mxu0 }
 0x42a   :  { %245 = vst [vmem:[#allocation4] sm:$0x3] %v242_v45 }
 0x42b   :  { %414 = shalt.err (!%p411_p12)
}
 0x42c   :  { %s415_s30 = scalar_lea.hbm %s605_s6, 32 }
 0x42d   :  { %p416_p13 = scmp.ne.s32.totalorder %s605_s6, %s415_s30  ;;  %p419_p0 = scmp.lt.u32.totalorder %s415_s30, %s605_s6 }
 0x42f   :  { %p421_p1 = pnand %p419_p0, %p416_p13 }
 0x431   :  { %424 = shalt.err (!%p421_p1)
}
 0x432   :  { %255 = dma.vmem_to_hbm [thread:$0]  %s253_s0, 32, %s605_s6, [#allocation5]  }
 0x433   :  { %447 = dma.done.wait [#allocation5], 32  }
 0x434   :  { %448 = vsyncadd [#allocation5], 4294967264 }
 0x435   :  { %259 = vsyncpa [#allocation5], 1 }

</bundles_post_ra>
